<compile_context>
chip_gen: v6e
topology: v6e:2x2x1
jax: 0.10.0
libtpu: 0.0.40
codegen_flags: <defaults>
</compile_context>

<pallas_src>
import functools

import jax
import jax.numpy as jnp
from jax.experimental import pallas as pl
from jax.experimental.pallas import tpu as pltpu

_LANE = 128
_SUBLANE = 8


def _gce_kernel(pred_ref, labels_ref, out_ref, acc_ref, *,
                q, n_total, tile_n, blocks_per_split, hard_labels, mask_tail):
    s = pl.program_id(0)          # parallel split axis (per-core row range)
    i = pl.program_id(1)          # reduction axis (row tiles within split)

    @pl.when(i == 0)
    def _():
        acc_ref[...] = jnp.zeros_like(acc_ref)

    # (TN, C) tile; cast to f32 in-kernel (inputs may be bf16).
    logits = pred_ref[...].astype(jnp.float32)

    # Numerically stable softmax over the class (lane) axis.
    m = jnp.max(logits, axis=1, keepdims=True)             # (TN, 1)
    e = jnp.exp(logits - m)                                 # (TN, C)
    denom = jnp.sum(e, axis=1, keepdims=True)               # (TN, 1)
    # Exact division: denom is per-row only, so this costs ~nothing and keeps
    # the scalar loss exact (no approx-reciprocal tolerance hack).
    p = e / denom                                           # (TN, C)

    # clamp(min=1e-7, max=1.0)
    p = jnp.clip(p, 1e-7, 1.0)

    if hard_labels:
        lbl = labels_ref[...]                               # (TN, 1) int32
        cls = jax.lax.broadcasted_iota(jnp.int32, p.shape, 1)
        inner = jnp.sum(jnp.where(cls == lbl, p, 0.0),
                        axis=1, keepdims=True)              # (TN, 1)
    else:
        labels = labels_ref[...].astype(jnp.float32)        # (TN, C)
        inner = jnp.sum(labels * p, axis=1, keepdims=True)  # (TN, 1)

    # (1 - inner^q) / q
    gce = (1.0 - jnp.power(inner, q)) * (1.0 / q)           # (TN, 1)

    if mask_tail:
        # where-based mask: NaN/Inf from garbage in padded tail rows must not
        # propagate into the sum (do NOT replace with multiply-by-mask).
        block_idx = s * blocks_per_split + i
        row = (jax.lax.broadcasted_iota(jnp.int32, gce.shape, 0)
               + block_idx * tile_n)
        gce = jnp.where(row < n_total, gce, 0.0)

    # Vector accumulator: plain per-tile vadd, no per-tile XLU tree reduce.
    acc_ref[...] += gce                                     # (TN, 1)

    @pl.when(i == pl.num_programs(1) - 1)
    def _():
        total = jnp.sum(acc_ref[...], keepdims=True)        # (1, 1)
        out_ref[...] = jnp.broadcast_to(total, out_ref.shape)   # (1, 128)


def _vmem_capacity_bytes():
    try:
        info = pltpu.get_tpu_info()
        cap = getattr(info, "vmem_capacity_bytes", None)
        if cap:
            return int(cap)
    except Exception:
        pass
    return 64 * 1024 * 1024   # conservative default (v7x per-TC VMEM)


def gce_loss(pred, labels, q=0.7, tile_n=None):
    """GCE loss.

    pred:   (N, C) logits (f32 or bf16).
    labels: (N, C) dense label weights (one-hot / soft labels), OR an integer
            array of shape (N,) / (N, 1) of class ids (hard-label fast path).
    """
    n, c = pred.shape

    hard_labels = jnp.issubdtype(labels.dtype, jnp.integer)
    if hard_labels:
        labels_arr = labels.reshape(n, 1).astype(jnp.int32)
    else:
        assert labels.shape == (n, c)
        labels_arr = labels

    # --- padding-aware tile sizing ------------------------------------------
    c_pad = _LANE * pl.cdiv(c, _LANE)          # lane-padded class width
    pred_row = c_pad * jnp.dtype(pred.dtype).itemsize
    if hard_labels:
        lbl_row = _LANE * 4                    # (TN, 1) int32, lane-padded
    else:
        lbl_row = c_pad * jnp.dtype(labels_arr.dtype).itemsize
    # Per tile row: 2x-buffered inputs + ~6 lane-padded f32 temporaries for
    # the softmax chain + the (TN, 1) f32 accumulator.
    per_row = 2 * (pred_row + lbl_row) + 6 * c_pad * 4 + _LANE * 4

    vmem_cap = _vmem_capacity_bytes()
    budget = vmem_cap // 3                     # leave generous headroom
    cap_rows = max(_SUBLANE, budget // per_row)

    tn = n if tile_n is None else min(int(tile_n), n)
    tn = min(tn, int(cap_rows))
    if tn < n:
        tn = max(_SUBLANE, (tn // _SUBLANE) * _SUBLANE)
    grid_n = pl.cdiv(n, tn)

    # Two-way split only when it maps cleanly onto whole blocks (no fully
    # out-of-range block indices); on v5e/v6e (single TC) it is a no-op.
    num_split = 2 if (grid_n >= 2 and grid_n % 2 == 0) else 1
    blocks_per_split = grid_n // num_split
    mask_tail = (n % tn) != 0

    kernel = functools.partial(
        _gce_kernel, q=float(q), n_total=n, tile_n=tn,
        blocks_per_split=blocks_per_split,
        hard_labels=hard_labels, mask_tail=mask_tail)

    def row_map(s_idx, i_idx):
        return (s_idx * blocks_per_split + i_idx, 0)

    in_specs = [
        pl.BlockSpec((tn, c), row_map),
        pl.BlockSpec((tn, 1) if hard_labels else (tn, c), row_map),
    ]

    out = pl.pallas_call(
        kernel,
        out_shape=jax.ShapeDtypeStruct((1, num_split * _LANE), jnp.float32),
        grid_spec=pltpu.PrefetchScalarGridSpec(
            num_scalar_prefetch=0,
            grid=(num_split, blocks_per_split),
            in_specs=in_specs,
            out_specs=pl.BlockSpec((1, _LANE), lambda s_idx, i_idx: (0, s_idx)),
            scratch_shapes=[pltpu.VMEM((tn, 1), jnp.float32)],
        ),
        compiler_params=pltpu.CompilerParams(
            dimension_semantics=("parallel", "arbitrary"),
            vmem_limit_bytes=int(min(vmem_cap, 2 * budget)),
        ),
    )(pred, labels_arr)

    # Per-split partial sums sit at lane 0 of each 128-lane output block.
    partials = out[0, ::_LANE]
    return jnp.sum(partials) * (1.0 / n)


if __name__ == "__main__":
    key = jax.random.PRNGKey(0)
    k1, k2 = jax.random.split(key)

    num_classes = 8
    batch = 44   # not a multiple of the row tile -> exercises tail masking

    pred = jax.random.normal(k1, (batch, num_classes), dtype=jnp.float32)
    label_idx = jax.random.randint(k2, (batch,), 0, num_classes)
    labels = jax.nn.one_hot(label_idx, num_classes, dtype=jnp.float32)

    # Pure-JAX reference (same math as the PyTorch module).
    p_ref = jax.nn.softmax(pred, axis=1)
    p_ref = jnp.clip(p_ref, 1e-7, 1.0)
    ref = jnp.mean(
        (1.0 - jnp.power(jnp.sum(labels * p_ref, axis=1), 0.7)) / 0.7)

    # 1) dense (one-hot / soft) labels, tiny tile -> multi-tile + tail-mask +
    #    two-way split path (grid = (2, 3)).
    loss_dense = gce_loss(pred, labels, q=0.7, tile_n=8)
    jax.block_until_ready(loss_dense)
    assert jnp.allclose(loss_dense, ref, atol=1e-5, rtol=1e-5), (loss_dense, ref)

    # 2) hard integer-label fast path (labels streamed as (N,1) int32).
    loss_hard = gce_loss(pred, label_idx.astype(jnp.int32), q=0.7, tile_n=8)
    jax.block_until_ready(loss_hard)
    assert jnp.allclose(loss_hard, ref, atol=1e-5, rtol=1e-5), (loss_hard, ref)

    # 3) auto tile size: single full-size tile, no masking, single split.
    loss_auto = gce_loss(pred, labels, q=0.7)
    jax.block_until_ready(loss_auto)
    assert jnp.allclose(loss_auto, ref, atol=1e-5, rtol=1e-5), (loss_auto, ref)

    print("KERNEL_OK")
</pallas_src>

<mosaic_0001>
module attributes {stable_mosaic.version = 11 : i64} {
  func.func @_gce_kernel(%arg0: i32, %arg1: i32, %arg2: memref<8x8xf32, #tpu.memory_space<vmem>>, %arg3: memref<8x8xf32, #tpu.memory_space<vmem>>, %arg4: memref<1x128xf32, #tpu.memory_space<vmem>>, %arg5: memref<8x1xf32, #tpu.memory_space<vmem>>) attributes {dimension_semantics = [#tpu.dimension_semantics<parallel>, #tpu.dimension_semantics<arbitrary>], iteration_bounds = array<i64: 2, 3>, scalar_prefetch = 0 : i64, scratch_operands = 1 : i64, tpu.core_type = #tpu.core_type<tc>, window_params = [{transform_indices = @transform_0, window_bounds = array<i64: 8, 8>}, {transform_indices = @transform_1, window_bounds = array<i64: 8, 8>}, {transform_indices = @transform_2, window_bounds = array<i64: 1, 128>}]} {
    %c0_i32 = arith.constant 0 : i32
    %0 = arith.cmpi eq, %arg1, %c0_i32 : i32
    %1 = arith.extui %0 : i1 to i32
    %c0_i32_0 = arith.constant 0 : i32
    %2 = arith.cmpi ne, %1, %c0_i32_0 : i32
    scf.if %2 {
      %cst_17 = arith.constant 0.000000e+00 : f32
      %43 = vector.broadcast %cst_17 : f32 to vector<8x1xf32>
      %c0_18 = arith.constant 0 : index
      %c0_19 = arith.constant 0 : index
      %44 = vector.load %arg5[%c0_18, %c0_19] : memref<8x1xf32, #tpu.memory_space<vmem>>, vector<8x1xf32>
      tpu.vector_store %arg5[%c0_18, %c0_19], %43 {strides = array<i32>} : memref<8x1xf32, #tpu.memory_space<vmem>>, vector<8x1xf32>,
    } else {
    }
    %c0 = arith.constant 0 : index
    %c0_1 = arith.constant 0 : index
    %3 = vector.load %arg2[%c0, %c0_1] : memref<8x8xf32, #tpu.memory_space<vmem>>, vector<8x8xf32>
    %cst = arith.constant dense<0xFF800000> : vector<8xf32>
    %4 = vector.multi_reduction <maximumf>, %3, %cst [1] : vector<8x8xf32> to vector<8xf32>
    %5 = vector.shape_cast %4 : vector<8xf32> to vector<8x1xf32>
    %6 = vector.broadcast %5 : vector<8x1xf32> to vector<8x8xf32>
    %7 = arith.subf %3, %6 : vector<8x8xf32>
    %8 = math.exp %7 : vector<8x8xf32>
    %cst_2 = arith.constant dense<0.000000e+00> : vector<8xf32>
    %9 = vector.multi_reduction <add>, %8, %cst_2 [1] : vector<8x8xf32> to vector<8xf32>
    %10 = vector.shape_cast %9 : vector<8xf32> to vector<8x1xf32>
    %11 = vector.broadcast %10 : vector<8x1xf32> to vector<8x8xf32>
    %12 = arith.divf %8, %11 : vector<8x8xf32>
    %cst_3 = arith.constant 1.000000e-07 : f32
    %cst_4 = arith.constant 1.000000e+00 : f32
    %13 = vector.broadcast %cst_3 : f32 to vector<8x8xf32>
    %14 = arith.maximumf %13, %12 : vector<8x8xf32>
    %15 = vector.broadcast %cst_4 : f32 to vector<8x8xf32>
    %16 = arith.minimumf %15, %14 : vector<8x8xf32>
    %c0_5 = arith.constant 0 : index
    %c0_6 = arith.constant 0 : index
    %17 = vector.load %arg3[%c0_5, %c0_6] : memref<8x8xf32, #tpu.memory_space<vmem>>, vector<8x8xf32>
    %18 = arith.mulf %17, %16 : vector<8x8xf32>
    %cst_7 = arith.constant dense<0.000000e+00> : vector<8xf32>
    %19 = vector.multi_reduction <add>, %18, %cst_7 [1] : vector<8x8xf32> to vector<8xf32>
    %20 = vector.shape_cast %19 : vector<8xf32> to vector<8x1xf32>
    %cst_8 = arith.constant 0.699999988 : f32
    %21 = vector.broadcast %cst_8 : f32 to vector<8x1xf32>
    %22 = math.powf %20, %21 : vector<8x1xf32>
    %cst_9 = arith.constant 1.000000e+00 : f32
    %23 = vector.broadcast %cst_9 : f32 to vector<8x1xf32>
    %24 = arith.subf %23, %22 : vector<8x1xf32>
    %cst_10 = arith.constant 1.42857146 : f32
    %25 = vector.broadcast %cst_10 : f32 to vector<8x1xf32>
    %26 = arith.mulf %24, %25 : vector<8x1xf32>
    %c3_i32 = arith.constant 3 : i32
    %27 = arith.muli %arg0, %c3_i32 : i32
    %28 = arith.addi %27, %arg1 : i32
    %29 = tpu.iota {dimensions = array<i32: 0>} : vector<8x1xi32>
    %c8_i32 = arith.constant 8 : i32
    %30 = arith.muli %28, %c8_i32 : i32
    %31 = vector.broadcast %30 : i32 to vector<8x1xi32>
    %32 = arith.addi %29, %31 : vector<8x1xi32>
    %c44_i32 = arith.constant 44 : i32
    %33 = vector.broadcast %c44_i32 : i32 to vector<8x1xi32>
    %34 = arith.cmpi slt, %32, %33 : vector<8x1xi32>
    %cst_11 = arith.constant 0.000000e+00 : f32
    %35 = vector.broadcast %cst_11 : f32 to vector<8x1xf32>
    %36 = arith.select %34, %26, %35 : vector<8x1xi1>, vector<8x1xf32>
    %c0_12 = arith.constant 0 : index
    %c0_13 = arith.constant 0 : index
    %37 = vector.load %arg5[%c0_12, %c0_13] : memref<8x1xf32, #tpu.memory_space<vmem>>, vector<8x1xf32>
    %38 = arith.addf %37, %36 : vector<8x1xf32>
    %c0_14 = arith.constant 0 : index
    %c0_15 = arith.constant 0 : index
    %39 = vector.load %arg5[%c0_14, %c0_15] : memref<8x1xf32, #tpu.memory_space<vmem>>, vector<8x1xf32>
    tpu.vector_store %arg5[%c0_14, %c0_15], %38 {strides = array<i32>} : memref<8x1xf32, #tpu.memory_space<vmem>>, vector<8x1xf32>,
    %c2_i32 = arith.constant 2 : i32
    %40 = arith.cmpi eq, %arg1, %c2_i32 : i32
    %41 = arith.extui %40 : i1 to i32
    %c0_i32_16 = arith.constant 0 : i32
    %42 = arith.cmpi ne, %41, %c0_i32_16 : i32
    scf.if %42 {
      %c0_17 = arith.constant 0 : index
      %c0_18 = arith.constant 0 : index
      %43 = vector.load %arg5[%c0_17, %c0_18] : memref<8x1xf32, #tpu.memory_space<vmem>>, vector<8x1xf32>
      %44 = vector.shape_cast %43 : vector<8x1xf32> to vector<1x8x1xf32>
      %cst_19 = arith.constant dense<0.000000e+00> : vector<1xf32>
      %45 = vector.multi_reduction <add>, %44, %cst_19 [1, 2] : vector<1x8x1xf32> to vector<1xf32>
      %46 = vector.shape_cast %45 : vector<1xf32> to vector<1x1x1xf32>
      %47 = vector.extract %46[0, 0, 0] : f32 from vector<1x1x1xf32>
      %48 = vector.broadcast %47 : f32 to vector<1x1xf32>
      %49 = vector.shape_cast %48 : vector<1x1xf32> to vector<1x1xf32>
      %50 = vector.broadcast %49 : vector<1x1xf32> to vector<1x128xf32>
      %c0_20 = arith.constant 0 : index
      %c0_21 = arith.constant 0 : index
      %51 = vector.load %arg4[%c0_20, %c0_21] : memref<1x128xf32, #tpu.memory_space<vmem>>, vector<1x128xf32>
      tpu.vector_store %arg4[%c0_20, %c0_21], %50 {strides = array<i32>} : memref<1x128xf32, #tpu.memory_space<vmem>>, vector<1x128xf32>,
    } else {
    }
    return
  }
  func.func @transform_0(%arg0: i32, %arg1: i32) -> (i32, i32) {
    %c3_i32 = arith.constant 3 : i32
    %0 = arith.muli %arg0, %c3_i32 : i32
    %1 = arith.addi %0, %arg1 : i32
    %c0_i32 = arith.constant 0 : i32
    %c0_i32_0 = arith.constant 0 : i32
    return %1, %c0_i32 : i32, i32
  }
  func.func @transform_1(%arg0: i32, %arg1: i32) -> (i32, i32) {
    %c3_i32 = arith.constant 3 : i32
    %0 = arith.muli %arg0, %c3_i32 : i32
    %1 = arith.addi %0, %arg1 : i32
    %c0_i32 = arith.constant 0 : i32
    %c0_i32_0 = arith.constant 0 : i32
    return %1, %c0_i32 : i32, i32
  }
  func.func @transform_2(%arg0: i32, %arg1: i32) -> (i32, i32) {
    %c0_i32 = arith.constant 0 : i32
    %c0_i32_0 = arith.constant 0 : i32
    return %c0_i32, %arg0 : i32, i32
  }
}

</mosaic_0001>

<bundles_post_ra>
// kernel: tpu_custom_call.1
= control target key start
LH: loop header
LB: loop body
LE: loop exit
PB: predicated region body
PF: predicated region fallthrough
CT: control target
= control target key end

     0   :  { %7 = vsyncpa [#allocation4], 0  ;;  %s717_s0 = inlined_call_operand.vmem [shape: f32[44,8], index: 0, kind: input, shape index: {}]   ;;  %s718_s1 = inlined_call_operand.vmem [shape: f32[44,8], index: 1, kind: input, shape index: {}]   ;;  %s719_s2 = inlined_call_operand.hbm [shape: f32[1,256], index: 2, kind: output, shape index: {}]  }
   0x1   :  { %9 = vsyncpa [#allocation4 + $0x1], 0  ;;  %s577_s9 = smov 0   ;;  %s579_s10 = smov 0  }
   0x2   :  { %s581_s11 = smov 0   ;;  %s583_s12 = smov 0  }
   0x3   :  { %s585_s13 = smov 0   ;;  %s587_s14 = smov 0  }
   0x4   :  { %s589_s15 = smov 0   ;;  %s591_s16 = smov 0  }
   0x5 LB: > { %s345_s17 = sadd.s32 4294967295, %s558_s16   ;;  %s346_s18 = sadd.s32 4294967294, %s558_s16   ;;  %s558_s16 = sphi %s591_s16, %s15_s16   ;;  %s554_s15 = sphi %s589_s15, %s728_s15   ;;  %s550_s14 = sphi %s587_s14, %s727_s14   ;;  %s546_s13 = sphi %s585_s13, %s726_s13   ;;  %s542_s12 = sphi %s583_s12, %s725_s12   ;;  %s538_s11 = sphi %s581_s11, %s724_s11   ;;  %s534_s10 = sphi %s579_s10, %s723_s10   ;;  %s530_s9 = sphi %s577_s9, %s722_s9  }
   0x6   : > { %s24_s19 = sadd.s32 1, %s550_s14  ;;  %s27_s20 = sadd.s32 1, %s554_s15 }
   0x7   : > { %p25_p0 = scmp.ge.s32.totalorder %s24_s19, 3  ;;  %p104_p1 = scmp.ne.s32.totalorder %s538_s11, %s534_s10 }
   0x8   : > { %p105_p2 = scmp.eq.s32.totalorder %s345_s17, 5  ;;  %p110_p4 = scmp.ne.s32.totalorder %s534_s10, %s530_s9 }
   0x9   : > { %s730_s19 = smov (%p25_p0, %s24_s19), 0  ;;  %s732_s20 = smov (!%p25_p0, %s27_s20), %s554_s15 }
   0xa   : > { %p626_p3 = por %p105_p2, %p104_p1  ;;  %p29_p5 = scmp.ge.s32.totalorder %s732_s20, 2 }
   0xb   : > { %p111_p6 = scmp.eq.s32.totalorder %s346_s18, 5  ;;  %p349_p7 = scmp.ge.s32.totalorder %s558_s16, 1 }
   0xc   : > { %p151_p8 = scmp.lt.s32.totalorder %s558_s16, 7  ;;  %s734_s20 = smov (%p29_p5, %s732_s20), 0 }
   0xd   : > { %p636_p9 = por %p111_p6, %p110_p4  ;;  %s91_s23 = ssub.s32 %s554_s15, %s734_s20 }
   0xe   : > { %p152_p10 = pnand %p349_p7, %p151_p8  ;;  %s94_s24 = sadd.s32 1, %s538_s11 }
   0xf   : > { %p92_p11 = scmp.eq.s32.totalorder %s91_s23, 0  ;;  %s177_s26 = sand.u32 (!%p152_p10), 1, %s534_s10  }
  0x10   : > { %155 = sbr.rel (%p152_p10) target bundleno = 765 (0x2fd), region = 28  ;;  %s661_s17 = scalar_lea.vmem (!%p152_p10), [#allocation3], %s177_s26 }
  0x11   : > { %s644_s25 = scalar_select %p92_p11, %s538_s11, %s94_s24  }
  0x12   : > { %s179_s27 = smul.u32 (!%p152_p10), 3, %s546_s13  ;;  %p352_p13 = scmp.ne.s32.totalorder (!%p152_p10), %s542_s12, 0 }
  0x14   : > { %s649_s28 = sadd.s32 (!%p152_p10), %s542_s12, %s179_s27 }
  0x15   : > { %p181_p12 = scmp.lt.s32.totalorder %s649_s28, 5 }
  0x16   : > { %198 = sbr.rel (%p352_p13) target bundleno = 29 (0x1d), region = 32 }
  0x17   : > { %s182_s29 = scalar_select %p181_p12, %s649_s28, 5 }
  0x19   : > { %s350_s30 = sshll.u32 %s182_s29, 3 }
  0x1a   : > { %s184_s5 = scalar_lea.vmem %s717_s0, %s350_s30  ;;  %s192_s8 = scalar_lea.vmem %s718_s1, %s350_s30 }
  0x1b   : > { %vm199_vm0 = vcmask 7168   ;;  %v560_v0 = vmov 0.0  }
  0x1c   : > { %200 = vst.msk [vmem:[#allocation2] sm:$0xff] %vm199_vm0, %v560_v0 }
  0x1d PF: > { %v201_v1 = vld [vmem:[%s184_s5] sm:$0xff]  ;;  %vm202_vm1 = vcmask 64512   ;;  %v226_v20 = vlaneseq  ;;  %s353_s18 = sshll.u32 %s649_s28, 3  ;;  %vm235_vm8 = vcmask 7168   ;;  %p354_p0 = scmp.ne.s32.totalorder %s542_s12, 2 }
  0x1e   : > { %v203_v2 = vsel %vm202_vm1, %v201_v1, -inf  ;;  %v216_v12 = vld [vmem:[%s192_s8] sm:$0xff]  ;;  %v229_v23 = vstv %s353_s18 }
  0x1f   : > { %204 = vmax.xlane.f32.xlu0 %v203_v2  ;;  %v227_v21 = vshrl.u32 %v226_v20, 7 }
  0x21   : > { %v230_v26 = vadd.s32 %v229_v23, %v227_v21 }
  0x23   : > { %vm231_vm7 = vcmp.lt.s32.totalorder %v230_v26, 44  ;;  %v233_v31 = vld [vmem:[#allocation2] sm:$0xff] }
  0xa8   : > { %v205_v3 = vpop.xlane.xlu0 %204 }
  0xa9   : > { %v206_v4 = vsub.f32 %v201_v1, %v205_v3 }
  0xab   : > { %v207_v5 = vmul.f32 1.442695, %v206_v4 }
  0xad   : > { %458 = vpow2.f32 %v207_v5 }
  0xba   : > { %v459_v6 = vpop.eup %458 }
  0xbb   : > { %v209_v7 = vsel %vm202_vm1, %v459_v6, 0.0 }
  0xbc   : > { %210 = vadd.xlane.f32.xlu0 %v209_v7 }
 0x145   : > { %v211_v8 = vpop.xlane.xlu0 %210 }
 0x146   : > { %460 = vrcp.f32 %v211_v8 }
 0x153   : > { %v461_v9 = vpop.eup %460 }
 0x154   : > { %v213_v10 = vmul.f32 %v461_v9, %v459_v6 }
 0x156   : > { %v214_v11 = vmax.f32 %v213_v10, 1e-07 }
 0x158   : > { %v215_v13 = vmin.f32 %v214_v11, 1.0 }
 0x15a   : > { %v217_v14 = vmul.f32 %v216_v12, %v215_v13 }
 0x15c   : > { %v218_v15 = vsel %vm202_vm1, %v217_v14, 0.0 }
 0x15d   : > { %219 = vadd.xlane.f32.xlu1 %v218_v15 }
 0x1e6   : > { %v220_v16 = vpop.xlane.xlu1 %219 }
 0x1e7   : > { %v362_v17 = vand.u32 2147483647, %v220_v16  ;;  %vm366_vm2 = vcmp.lt.f32.partialorder %v220_v16, 0  ;;  %vm367_vm3 = vcmp.eq.f32.partialorder %v220_v16, 0  ;;  %vm379_vm5 = vcmp.ne.f32.partialorder %v220_v16, %v220_v16 }
 0x1e8   : > { %vm368_vm6 = vcmp.eq.f32.partialorder %v220_v16, 1065353216 }
 0x1e9   : > { %462 = vlog2.f32 %v362_v17  ;;  %vm371_vm4 = vcmp.eq.f32.partialorder %v362_v17, 2139095040 }
 0x1f6   : > { %v463_v18 = vpop.eup %462 }
 0x1f7   : > { %v364_v19 = vmul.f32 0.7, %v463_v18 }
 0x1f9   : > { %464 = vpow2.f32 %v364_v19 }
 0x206   : > { %v465_v22 = vpop.eup %464 }
 0x207   : > { %v372_v24 = vsel %vm366_vm2, 2143289344, %v465_v22 }
 0x208   : > { %v373_v25 = vsel %vm367_vm3, 0, %v372_v24 }
 0x209   : > { %v378_v27 = vsel %vm371_vm4, 2139095040, %v373_v25 }
 0x20a   : > { %v382_v28 = vsel %vm379_vm5, 2143289344, %v378_v27 }
 0x20b   : > { %v383_v29 = vsel %vm368_vm6, 1065353216, %v382_v28 }
 0x20c   : > { %v222_v30 = vsub.f32 1.0, %v383_v29 }
 0x20e   : > { %v223_v32 = vmul.f32 1.4285715, %v222_v30 }
 0x20f   : > { %240 = sbr.rel (%p354_p0) target bundleno = 742 (0x2e6), region = 36 }
 0x210   : > { %v232_v33 = vsel %vm231_vm7, %v223_v32, 0.0 }
 0x211   : > { %v234_v34 = vadd.f32 %v233_v31, %v232_v33 }
 0x213   : > { %236 = vst.msk [vmem:[#allocation2] sm:$0xff] %vm235_vm8, %v234_v34 }
 0x21a   : > { %v241_v35 = vld [vmem:[#allocation2] sm:$0xff] }
 0x21b   : > { %v242_v36 = vsel %vm235_vm8, %v241_v35, 0.0 }
 0x21c   : > { %243 = vadd.xlane.f32.xlu0 %v242_v36 }
 0x2a5   : > { %v244_v37 = vpop.xlane.xlu0 %243 }
 0x2a6   : > { %v245_v38 = vrot.slane %v244_v37, 4 }
 0x2a8   : > { %v246_v39 = vadd.f32 %v245_v38, %v244_v37 }
 0x2aa   : > { %v247_v40 = vrot.slane %v246_v39, 2 }
 0x2ac   : > { %v248_v41 = vadd.f32 %v247_v40, %v246_v39 }
 0x2ae   : > { %v249_v42 = vrot.slane %v248_v41, 1 }
 0x2b0   : > { %v250_v43 = vadd.f32 %v249_v42, %v248_v41 }
 0x2b2   : > { %384 = vpush %v250_v43 }
 0x2e3   : > { %s385_s23 = spop %384 }
 0x2e4   : > { %v252_v44 = vstv %s385_s23 }
 0x2e5   : > { %253 = vst [vmem:[%s661_s17] sm:$0x1] %v252_v44 }
 0x2e6 PF: > { %s355_s12 = sshll.u32 %s546_s13, 4  ;;  %s267_s29 = sshll.u32 %s661_s17, 4  ;;  %s268_s29 = int_to_ptr.vmem [resolvable:$true] %s267_s29 }
 0x2e7   : > { %s265_s28 = scalar_lea.hbm %s719_s2, %s355_s12  ;;  %s255_s30 = scalar_lea.sflag [#allocation4], %s177_s26 }
 0x2e8   : > { %s466_s3 = scalar_lea.vmem %s268_s29, 16  ;;  %s561_s4 = smov [#allocation3]  }
 0x2e9   : > { %p467_p1 = scmp.ne.s32.totalorder %s268_s29, %s466_s3  ;;  %s470_s5 = sshll.u32 %s561_s4, 4  ;;  %s471_s5 = int_to_ptr.vmem [resolvable:$false] %s470_s5 }
 0x2ea   : > { %s472_s6 = scalar_lea.vmem %s471_s5, 32  ;;  %p473_p5 = scmp.lt.s32.totalorder %s268_s29, %s471_s5 }
 0x2eb   : > { %p468_p2 = pnand %p467_p1, %p626_p3  ;;  %p474_p6 = scmp.lt.s32.totalorder %s472_s6, %s466_s3 }
 0x2ed   : > { %p469_p4 = pneg %p468_p2  ;;  %p475_p7 = por %p474_p6, %p473_p5 }
 0x2ef   : > { %p476_p8 = pnand %p475_p7, %p469_p4 }
 0x2f1   : > { %479 = shalt.err (!%p476_p8)
}
 0x2f2   : > { %s480_s13 = scalar_lea.hbm %s265_s28, 16  ;;  %s484_s8 = scalar_lea.hbm %s719_s2, 32 }
 0x2f3   : > { %p481_p10 = scmp.ne.s32.totalorder %s265_s28, %s480_s13  ;;  %p485_p13 = scmp.lt.s32.totalorder %s265_s28, %s719_s2 }
 0x2f4   : > { %p486_p0 = scmp.lt.s32.totalorder %s484_s8, %s480_s13 }
 0x2f5   : > { %p482_p11 = pnand %p481_p10, %p626_p3 }
 0x2f6   : > { %p487_p1 = por %p486_p0, %p485_p13 }
 0x2f7   : > { %p483_p12 = pneg %p482_p11 }
 0x2f9   : > { %p488_p2 = pnand %p487_p1, %p483_p12 }
 0x2fb   : > { %491 = shalt.err (!%p488_p2)
}
 0x2fc   : > { %386 = dma.vmem_to_hbm [thread:$0]  (%p626_p3), %s268_s29, 16, %s265_s28, %s255_s30  }
 0x2fd PF: > { %p392_p4 = scmp.ge.s32.totalorder %s558_s16, 2  ;;  %s279_s23 = sand.u32 1, %s530_s9  }
 0x2fe   : > { %s280_s12 = scalar_lea.sflag [#allocation4], %s279_s23 }
 0x2ff   : > { %p389_p5 = pnand %p392_p4, %p636_p9 }
 0x301   : > { %p390_p6 = pneg %p389_p5 }
 0x303   : > { %525 = dma.done.wait (%p390_p6), %s280_s12, 16  }
 0x304   : > { %527 = vsyncadd (%p390_p6), %s280_s12, 4294967280  ;;  %s15_s16 = sadd.s32 1, %s558_s16   ;;  %s722_s9 = smov %s534_s10 }
 0x305   : > { %p12_p7 = scmp.ge.s32.totalorder %s15_s16, 8   ;;  %s723_s10 = smov %s538_s11 }
 0x306   : > { %s724_s11 = smov %s644_s25  ;;  %s725_s12 = smov %s550_s14 }
 0x307   : > { %s726_s13 = smov %s554_s15  ;;  %s727_s14 = smov %s730_s19 }
 0x308   : > { %s728_s15 = smov %s734_s20  ;;  %14 = sbr.rel (!%p12_p7) target bundleno = 5 (0x5), region = 74 }
 0x30d   :  { %284 = vsyncpa [#allocation4], 1 }
 0x30e   :  { %286 = vsyncpa [#allocation4 + $0x1], 1 }

</bundles_post_ra>
